<compile_context>
chip_gen: v5e
topology: v5e:2x2
jax: 0.10.0
libtpu: 0.0.40
codegen_flags: <defaults>
</compile_context>

<pallas_src>
import functools

import jax
import jax.numpy as jnp
import numpy as np
from jax import lax
from jax.experimental import pallas as pl
from jax.experimental.pallas import tpu as pltpu

NEG_SLOPE = -0.08  # x3 = x1 * -0.08 ; x4 = where(x1 > 0, x1, x3)


def _round_up(x, m):
    return ((x + m - 1) // m) * m


@functools.lru_cache(maxsize=None)
def _roll_matches_np_roll():
    """One-time probe: does pltpu.roll(x, L-1, -1)[i] == x[i+1] (np.roll)?

    Used to pick the cheap XLU-roll path for the kw=1 taps; any surprise
    (different convention, lowering error) falls back to direct slices.
    """
    try:
        L = 128

        def k(x_ref, o_ref):
            o_ref[...] = pltpu.roll(x_ref[...], shift=L - 1, axis=-1)

        x = jnp.broadcast_to(jnp.arange(L, dtype=jnp.float32), (8, L))
        y = pl.pallas_call(
            k, out_shape=jax.ShapeDtypeStruct((8, L), jnp.float32))(x)
        return bool(np.asarray(jax.block_until_ready(y))[0, 0] == 1.0)
    except Exception:
        return False


def _make_kernel(kD, kH, kW, Wpad, Sout_pad, DT, use_roll):
    """Kernel factory closing over the static conv geometry."""
    assert (kD, kH, kW) == (2, 2, 2), "specialised for kernel_size=2"
    lane_roll = Sout_pad - 1  # == np.roll shift of -1 (wrap lands in junk col)

    def kernel(main_ref, bnd_ref, w_ref, b_ref, o_ref):
        # main_ref: (1, DT, Cpad, Spad) bf16 -- depths [c*DT, c*DT+DT)
        # bnd_ref : (1, 1,  Cpad, Spad) bf16 -- depth   c*DT+DT
        # w_ref   : (Cout, K_pad) bf16 ; b_ref: (Cout, 1) f32
        # o_ref   : (1, Cout, DT*Sout_pad) f32
        for t in range(DT):                       # static unroll over depths
            taps = []
            for kd in range(kD):
                di = t + kd
                for kh in range(kH):
                    lo = kh * Wpad
                    if di < DT:
                        base = main_ref[0, di, :, lo:lo + Sout_pad]
                    else:
                        base = bnd_ref[0, di - DT, :, lo:lo + Sout_pad]
                    taps.append(base)                                # kw = 0
                    if use_roll:
                        # XLU lane rotate; wrapped elem only hits a column
                        # the wrapper discards (needs Wpad == Wout+1).
                        taps.append(pltpu.roll(base, shift=lane_roll, axis=-1))
                    else:
                        if di < DT:
                            taps.append(main_ref[0, di, :, lo + 1:lo + 1 + Sout_pad])
                        else:
                            taps.append(bnd_ref[0, di - DT, :, lo + 1:lo + 1 + Sout_pad])
            patches = jnp.concatenate(taps, axis=0)        # (K_pad, Sout_pad)
            # One wide MXU matmul (do NOT split K), f32 accumulate.
            acc = jnp.dot(w_ref[...], patches,
                          preferred_element_type=jnp.float32)  # (Cout, Sout_pad)
            y = acc + b_ref[...]
            o_ref[0, :, t * Sout_pad:(t + 1) * Sout_pad] = jnp.where(
                y > 0, y, y * NEG_SLOPE).astype(o_ref.dtype)

    return kernel


def conv_transpose3d_leaky(x_ncdhw, w_pt, b_pt):
    """ConvTranspose3d(kernel=2, stride=1, padding=0, bias=True) followed by
    torch.where(x1 > 0, x1, x1 * -0.08).

    x_ncdhw: (N, Cin, D, H, W) f32 (PyTorch NCDHW)
    w_pt:    (Cin, Cout, kD, kH, kW) f32 (PyTorch ConvTranspose3d weight)
    b_pt:    (Cout,) f32
    returns: (N, Cout, D+1, H+1, W+1) f32 (NCDHW)
    """
    N, Cin, D, H, W = x_ncdhw.shape
    Cin_w, Cout, kD, kH, kW = w_pt.shape
    assert Cin == Cin_w
    assert (kD, kH, kW) == (2, 2, 2), "module uses kernel_size=2, stride=1, pad=0"

    Dout, Hout, Wout = D + kD - 1, H + kH - 1, W + kW - 1
    Wpad = W + 2 * (kW - 1)
    # garbage-column + roll tricks require exactly one junk column per row
    assert Wpad == Wout + 1

    Cpad = _round_up(Cin, 16)            # bf16 sublane-tile aligned channel pad
    K_pad = kD * kH * kW * Cpad          # 8 * 16 = 128 for this module

    Sout = Hout * Wpad                   # flattened output plane (Wpad stride)
    Sout_pad = _round_up(Sout, 128)      # lane-dense stores / MXU streams

    # ---- depth chunking --------------------------------------------------
    DT = min(4, Dout)
    n_chunks = -(-Dout // DT)
    Dout_pad = n_chunks * DT
    Dpad2 = Dout_pad + (kD - 1)          # padded input depth planes

    # ---- single fused input pad ------------------------------------------
    # Fold depth / channel / H (incl. lane-alignment tail) / W padding into
    # one jnp.pad; the flattened plane length Spad = H_ext * Wpad is big
    # enough for the largest in-kernel tap slice (works for both tap paths).
    Hpad = H + 2 * (kH - 1)
    need = (kH - 1) * Wpad + (kW - 1) + Sout_pad
    H_ext = -(-need // Wpad)
    Spad = H_ext * Wpad

    x = x_ncdhw.astype(jnp.bfloat16)                        # cast early (half traffic)
    x = jnp.transpose(x, (0, 2, 1, 3, 4))                   # (N, D, Cin, H, W)
    x = jnp.pad(x, ((0, 0),
                    (kD - 1, Dpad2 - (kD - 1) - D),
                    (0, Cpad - Cin),
                    (kH - 1, H_ext - Hpad + (kH - 1)),
                    (kW - 1, kW - 1)))
    x = x.reshape(N, Dpad2, Cpad, Spad)

    # ---- weights: flipped kernel -> (Cout, K_pad) bf16; K order (kd,kh,kw,ci)
    w_flip = jnp.flip(w_pt, axis=(2, 3, 4))                 # (Cin,Cout,kD,kH,kW)
    w_k = jnp.transpose(w_flip, (2, 3, 4, 0, 1))            # (kD,kH,kW,Cin,Cout)
    w_k = jnp.pad(w_k, ((0, 0), (0, 0), (0, 0), (0, Cpad - Cin), (0, 0)))
    w_t = w_k.reshape(K_pad, Cout).T.astype(jnp.bfloat16)   # (Cout, K_pad)
    b2 = b_pt.reshape(Cout, 1).astype(jnp.float32)

    kernel = _make_kernel(kD, kH, kW, Wpad, Sout_pad, DT, _roll_matches_np_roll())

    out_flat = pl.pallas_call(
        kernel,
        out_shape=jax.ShapeDtypeStruct((N, Cout, Dout_pad * Sout_pad), jnp.float32),
        grid=(N, n_chunks),
        in_specs=[
            # DT consecutive depth planes of the padded input
            pl.BlockSpec((1, DT, Cpad, Spad), lambda n, d: (n, d, 0, 0)),
            # one boundary plane (first plane of the next chunk)
            pl.BlockSpec((1, 1, Cpad, Spad),
                         lambda n, d, _DT=DT: (n, d * _DT + _DT, 0, 0)),
            pl.BlockSpec((Cout, K_pad), lambda n, d: (0, 0)),   # resident weights
            pl.BlockSpec((Cout, 1), lambda n, d: (0, 0)),       # resident bias
        ],
        out_specs=pl.BlockSpec((1, Cout, DT * Sout_pad), lambda n, d: (n, 0, d)),
        compiler_params=pltpu.CompilerParams(
            dimension_semantics=("parallel", "parallel")),
    )(x, x, w_t, b2)

    # ---- layout plumbing only: drop junk depth/lane tails + garbage column
    out = out_flat.reshape(N, Cout, Dout_pad, Sout_pad)
    out = out[:, :, :Dout, :Sout].reshape(N, Cout, Dout, Hout, Wpad)[..., :Wout]
    return out                                              # (N,Cout,Dout,Hout,Wout)


def model_forward(x16, w1, b1):
    x4 = conv_transpose3d_leaky(x16, w1, b1)
    # TODO(synk): self.conv_t2 = ConvTranspose2d(330, 427, 4, stride=2, padding=1)
    # cannot be applied to x4: x4 is a 5-D, 41-channel tensor while ConvTranspose2d
    # expects a 4-D, 330-channel input -- the reference PyTorch forward raises at
    # that call, so we return x4 (the last well-defined value of the forward).
    return x4


def ref_forward(x_ncdhw, w_pt, b_pt):
    """Pure-JAX f32 reference (lax conv) for the well-defined part of forward."""
    Cin, Cout, kD, kH, kW = w_pt.shape
    x = jnp.transpose(x_ncdhw, (0, 2, 3, 4, 1))
    w_dhwio = jnp.transpose(jnp.flip(w_pt, axis=(2, 3, 4)), (2, 3, 4, 0, 1))
    y = lax.conv_general_dilated(
        x, w_dhwio, window_strides=(1, 1, 1),
        padding=((kD - 1, kD - 1), (kH - 1, kH - 1), (kW - 1, kW - 1)),
        dimension_numbers=("NDHWC", "DHWIO", "NDHWC"))
    y = y + b_pt
    y = jnp.where(y > 0, y, y * NEG_SLOPE)
    return jnp.transpose(y, (0, 4, 1, 2, 3))


if __name__ == "__main__":
    key = jax.random.PRNGKey(0)
    k1, k2, k3, k4 = jax.random.split(key, 4)

    # Small shapes consistent with the module: channels fixed by __init__,
    # spatial dims shrunk from (49, 84, 51) to keep the example small.
    N, Cin, D, H, W = 2, 14, 5, 6, 7
    Cout, KS = 41, 2

    x16 = jax.random.normal(k1, (N, Cin, D, H, W), dtype=jnp.float32)

    # deterministic parameter init (PyTorch-like uniform fan-in bound)
    bound = 1.0 / np.sqrt(Cin * KS ** 3)
    w1 = jax.random.uniform(k2, (Cin, Cout, KS, KS, KS), jnp.float32,
                            -bound, bound)
    b1 = jax.random.uniform(k3, (Cout,), jnp.float32, -bound, bound)
    # conv_t2 parameters exist in __init__ but are unusable in forward (see TODO)
    w2_unused = jax.random.uniform(k4, (330, 427, 4, 4), jnp.float32,
                                   -0.01, 0.01)

    out = jax.jit(lambda x: model_forward(x, w1, b1))(x16)
    out = jax.block_until_ready(out)

    ref = ref_forward(x16, w1, b1)
    # bf16 activation/weight streams (f32 accumulate) => looser tolerance.
    np.testing.assert_allclose(np.asarray(out), np.asarray(ref),
                               rtol=2e-2, atol=2e-2)
    assert out.shape == (N, Cout, D + 1, H + 1, W + 1)

    print("KERNEL_OK")
</pallas_src>

<mosaic_0001>
module attributes {stable_mosaic.version = 11 : i64} {
  func.func @kernel(%arg0: i32, %arg1: i32, %arg2: memref<1x4x16x144xbf16, #tpu.memory_space<vmem>>, %arg3: memref<1x1x16x144xbf16, #tpu.memory_space<vmem>>, %arg4: memref<41x128xbf16, #tpu.memory_space<vmem>>, %arg5: memref<41x1xf32, #tpu.memory_space<vmem>>, %arg6: memref<1x41x512xf32, #tpu.memory_space<vmem>>) attributes {dimension_semantics = [#tpu.dimension_semantics<parallel>, #tpu.dimension_semantics<parallel>], iteration_bounds = array<i64: 2, 2>, scalar_prefetch = 0 : i64, scratch_operands = 0 : i64, tpu.core_type = #tpu.core_type<tc>, window_params = [{transform_indices = @transform_0, window_bounds = array<i64: 1, 4, 16, 144>}, {transform_indices = @transform_1, window_bounds = array<i64: 1, 1, 16, 144>}, {pipeline_mode = #tpu.pipeline_mode<synchronous>, transform_indices = @transform_2, window_bounds = array<i64: 41, 128>}, {pipeline_mode = #tpu.pipeline_mode<synchronous>, transform_indices = @transform_3, window_bounds = array<i64: 41, 1>}, {transform_indices = @transform_4, window_bounds = array<i64: 1, 41, 512>}]} {
    %c0 = arith.constant 0 : index
    %c0_0 = arith.constant 0 : index
    %c0_1 = arith.constant 0 : index
    %c0_2 = arith.constant 0 : index
    %0 = vector.load %arg2[%c0, %c0_0, %c0_1, %c0_2] : memref<1x4x16x144xbf16, #tpu.memory_space<vmem>>, vector<1x1x16x128xbf16>
    %1 = vector.shape_cast %0 : vector<1x1x16x128xbf16> to vector<16x128xbf16>
    %c0_3 = arith.constant 0 : index
    %c0_4 = arith.constant 0 : index
    %c0_5 = arith.constant 0 : index
    %c1 = arith.constant 1 : index
    %2 = vector.load %arg2[%c0_3, %c0_4, %c0_5, %c1] : memref<1x4x16x144xbf16, #tpu.memory_space<vmem>>, vector<1x1x16x128xbf16>
    %3 = vector.shape_cast %2 : vector<1x1x16x128xbf16> to vector<16x128xbf16>
    %c0_6 = arith.constant 0 : index
    %c0_7 = arith.constant 0 : index
    %c0_8 = arith.constant 0 : index
    %c9 = arith.constant 9 : index
    %4 = vector.load %arg2[%c0_6, %c0_7, %c0_8, %c9] : memref<1x4x16x144xbf16, #tpu.memory_space<vmem>>, vector<1x1x16x128xbf16>
    %5 = vector.shape_cast %4 : vector<1x1x16x128xbf16> to vector<16x128xbf16>
    %c0_9 = arith.constant 0 : index
    %c0_10 = arith.constant 0 : index
    %c0_11 = arith.constant 0 : index
    %c10 = arith.constant 10 : index
    %6 = vector.load %arg2[%c0_9, %c0_10, %c0_11, %c10] : memref<1x4x16x144xbf16, #tpu.memory_space<vmem>>, vector<1x1x16x128xbf16>
    %7 = vector.shape_cast %6 : vector<1x1x16x128xbf16> to vector<16x128xbf16>
    %c0_12 = arith.constant 0 : index
    %c1_13 = arith.constant 1 : index
    %c0_14 = arith.constant 0 : index
    %c0_15 = arith.constant 0 : index
    %8 = vector.load %arg2[%c0_12, %c1_13, %c0_14, %c0_15] : memref<1x4x16x144xbf16, #tpu.memory_space<vmem>>, vector<1x1x16x128xbf16>
    %9 = vector.shape_cast %8 : vector<1x1x16x128xbf16> to vector<16x128xbf16>
    %c0_16 = arith.constant 0 : index
    %c1_17 = arith.constant 1 : index
    %c0_18 = arith.constant 0 : index
    %c1_19 = arith.constant 1 : index
    %10 = vector.load %arg2[%c0_16, %c1_17, %c0_18, %c1_19] : memref<1x4x16x144xbf16, #tpu.memory_space<vmem>>, vector<1x1x16x128xbf16>
    %11 = vector.shape_cast %10 : vector<1x1x16x128xbf16> to vector<16x128xbf16>
    %c0_20 = arith.constant 0 : index
    %c1_21 = arith.constant 1 : index
    %c0_22 = arith.constant 0 : index
    %c9_23 = arith.constant 9 : index
    %12 = vector.load %arg2[%c0_20, %c1_21, %c0_22, %c9_23] : memref<1x4x16x144xbf16, #tpu.memory_space<vmem>>, vector<1x1x16x128xbf16>
    %13 = vector.shape_cast %12 : vector<1x1x16x128xbf16> to vector<16x128xbf16>
    %c0_24 = arith.constant 0 : index
    %c1_25 = arith.constant 1 : index
    %c0_26 = arith.constant 0 : index
    %c10_27 = arith.constant 10 : index
    %14 = vector.load %arg2[%c0_24, %c1_25, %c0_26, %c10_27] : memref<1x4x16x144xbf16, #tpu.memory_space<vmem>>, vector<1x1x16x128xbf16>
    %15 = vector.shape_cast %14 : vector<1x1x16x128xbf16> to vector<16x128xbf16>
    %16 = tpu.concatenate %1, %3, %5, %7, %9, %11, %13, %15 in 0 : vector<16x128xbf16>, vector<16x128xbf16>, vector<16x128xbf16>, vector<16x128xbf16>, vector<16x128xbf16>, vector<16x128xbf16>, vector<16x128xbf16>, vector<16x128xbf16> -> vector<128x128xbf16>
    %c0_28 = arith.constant 0 : index
    %c0_29 = arith.constant 0 : index
    %17 = vector.load %arg4[%c0_28, %c0_29] : memref<41x128xbf16, #tpu.memory_space<vmem>>, vector<41x128xbf16>
    %cst = arith.constant dense<0.000000e+00> : vector<41x128xf32>
    %18 = tpu.matmul %17, %16, %cst {dimension_numbers = #tpu.dot_dimension_numbers<[1], [0], [0], [1], [0, 0, 1, 1], [], []>} : vector<41x128xbf16>, vector<128x128xbf16>, vector<41x128xf32> -> vector<41x128xf32>
    %c0_30 = arith.constant 0 : index
    %c0_31 = arith.constant 0 : index
    %19 = vector.load %arg5[%c0_30, %c0_31] : memref<41x1xf32, #tpu.memory_space<vmem>>, vector<41x1xf32>
    %20 = vector.broadcast %19 : vector<41x1xf32> to vector<41x128xf32>
    %21 = arith.addf %18, %20 : vector<41x128xf32>
    %cst_32 = arith.constant 0.000000e+00 : f32
    %22 = vector.broadcast %cst_32 : f32 to vector<41x128xf32>
    %23 = arith.cmpf ogt, %21, %22 : vector<41x128xf32>
    %cst_33 = arith.constant -8.000000e-02 : f32
    %24 = vector.broadcast %cst_33 : f32 to vector<41x128xf32>
    %25 = arith.mulf %21, %24 : vector<41x128xf32>
    %26 = arith.select %23, %21, %25 : vector<41x128xi1>, vector<41x128xf32>
    %c0_34 = arith.constant 0 : index
    %c0_35 = arith.constant 0 : index
    %c0_36 = arith.constant 0 : index
    %27 = vector.load %arg6[%c0_34, %c0_35, %c0_36] : memref<1x41x512xf32, #tpu.memory_space<vmem>>, vector<1x41x128xf32>
    %28 = vector.shape_cast %27 : vector<1x41x128xf32> to vector<41x128xf32>
    %29 = vector.shape_cast %26 : vector<41x128xf32> to vector<1x41x128xf32>
    tpu.vector_store %arg6[%c0_34, %c0_35, %c0_36], %29 {strides = array<i32>} : memref<1x41x512xf32, #tpu.memory_space<vmem>>, vector<1x41x128xf32>,
    %c0_37 = arith.constant 0 : index
    %c1_38 = arith.constant 1 : index
    %c0_39 = arith.constant 0 : index
    %c0_40 = arith.constant 0 : index
    %30 = vector.load %arg2[%c0_37, %c1_38, %c0_39, %c0_40] : memref<1x4x16x144xbf16, #tpu.memory_space<vmem>>, vector<1x1x16x128xbf16>
    %31 = vector.shape_cast %30 : vector<1x1x16x128xbf16> to vector<16x128xbf16>
    %c0_41 = arith.constant 0 : index
    %c1_42 = arith.constant 1 : index
    %c0_43 = arith.constant 0 : index
    %c1_44 = arith.constant 1 : index
    %32 = vector.load %arg2[%c0_41, %c1_42, %c0_43, %c1_44] : memref<1x4x16x144xbf16, #tpu.memory_space<vmem>>, vector<1x1x16x128xbf16>
    %33 = vector.shape_cast %32 : vector<1x1x16x128xbf16> to vector<16x128xbf16>
    %c0_45 = arith.constant 0 : index
    %c1_46 = arith.constant 1 : index
    %c0_47 = arith.constant 0 : index
    %c9_48 = arith.constant 9 : index
    %34 = vector.load %arg2[%c0_45, %c1_46, %c0_47, %c9_48] : memref<1x4x16x144xbf16, #tpu.memory_space<vmem>>, vector<1x1x16x128xbf16>
    %35 = vector.shape_cast %34 : vector<1x1x16x128xbf16> to vector<16x128xbf16>
    %c0_49 = arith.constant 0 : index
    %c1_50 = arith.constant 1 : index
    %c0_51 = arith.constant 0 : index
    %c10_52 = arith.constant 10 : index
    %36 = vector.load %arg2[%c0_49, %c1_50, %c0_51, %c10_52] : memref<1x4x16x144xbf16, #tpu.memory_space<vmem>>, vector<1x1x16x128xbf16>
    %37 = vector.shape_cast %36 : vector<1x1x16x128xbf16> to vector<16x128xbf16>
    %c0_53 = arith.constant 0 : index
    %c2 = arith.constant 2 : index
    %c0_54 = arith.constant 0 : index
    %c0_55 = arith.constant 0 : index
    %38 = vector.load %arg2[%c0_53, %c2, %c0_54, %c0_55] : memref<1x4x16x144xbf16, #tpu.memory_space<vmem>>, vector<1x1x16x128xbf16>
    %39 = vector.shape_cast %38 : vector<1x1x16x128xbf16> to vector<16x128xbf16>
    %c0_56 = arith.constant 0 : index
    %c2_57 = arith.constant 2 : index
    %c0_58 = arith.constant 0 : index
    %c1_59 = arith.constant 1 : index
    %40 = vector.load %arg2[%c0_56, %c2_57, %c0_58, %c1_59] : memref<1x4x16x144xbf16, #tpu.memory_space<vmem>>, vector<1x1x16x128xbf16>
    %41 = vector.shape_cast %40 : vector<1x1x16x128xbf16> to vector<16x128xbf16>
    %c0_60 = arith.constant 0 : index
    %c2_61 = arith.constant 2 : index
    %c0_62 = arith.constant 0 : index
    %c9_63 = arith.constant 9 : index
    %42 = vector.load %arg2[%c0_60, %c2_61, %c0_62, %c9_63] : memref<1x4x16x144xbf16, #tpu.memory_space<vmem>>, vector<1x1x16x128xbf16>
    %43 = vector.shape_cast %42 : vector<1x1x16x128xbf16> to vector<16x128xbf16>
    %c0_64 = arith.constant 0 : index
    %c2_65 = arith.constant 2 : index
    %c0_66 = arith.constant 0 : index
    %c10_67 = arith.constant 10 : index
    %44 = vector.load %arg2[%c0_64, %c2_65, %c0_66, %c10_67] : memref<1x4x16x144xbf16, #tpu.memory_space<vmem>>, vector<1x1x16x128xbf16>
    %45 = vector.shape_cast %44 : vector<1x1x16x128xbf16> to vector<16x128xbf16>
    %46 = tpu.concatenate %31, %33, %35, %37, %39, %41, %43, %45 in 0 : vector<16x128xbf16>, vector<16x128xbf16>, vector<16x128xbf16>, vector<16x128xbf16>, vector<16x128xbf16>, vector<16x128xbf16>, vector<16x128xbf16>, vector<16x128xbf16> -> vector<128x128xbf16>
    %c0_68 = arith.constant 0 : index
    %c0_69 = arith.constant 0 : index
    %47 = vector.load %arg4[%c0_68, %c0_69] : memref<41x128xbf16, #tpu.memory_space<vmem>>, vector<41x128xbf16>
    %cst_70 = arith.constant dense<0.000000e+00> : vector<41x128xf32>
    %48 = tpu.matmul %47, %46, %cst_70 {dimension_numbers = #tpu.dot_dimension_numbers<[1], [0], [0], [1], [0, 0, 1, 1], [], []>} : vector<41x128xbf16>, vector<128x128xbf16>, vector<41x128xf32> -> vector<41x128xf32>
    %c0_71 = arith.constant 0 : index
    %c0_72 = arith.constant 0 : index
    %49 = vector.load %arg5[%c0_71, %c0_72] : memref<41x1xf32, #tpu.memory_space<vmem>>, vector<41x1xf32>
    %50 = vector.broadcast %49 : vector<41x1xf32> to vector<41x128xf32>
    %51 = arith.addf %48, %50 : vector<41x128xf32>
    %cst_73 = arith.constant 0.000000e+00 : f32
    %52 = vector.broadcast %cst_73 : f32 to vector<41x128xf32>
    %53 = arith.cmpf ogt, %51, %52 : vector<41x128xf32>
    %cst_74 = arith.constant -8.000000e-02 : f32
    %54 = vector.broadcast %cst_74 : f32 to vector<41x128xf32>
    %55 = arith.mulf %51, %54 : vector<41x128xf32>
    %56 = arith.select %53, %51, %55 : vector<41x128xi1>, vector<41x128xf32>
    %c0_75 = arith.constant 0 : index
    %c0_76 = arith.constant 0 : index
    %c128 = arith.constant 128 : index
    %57 = vector.load %arg6[%c0_75, %c0_76, %c128] : memref<1x41x512xf32, #tpu.memory_space<vmem>>, vector<1x41x128xf32>
    %58 = vector.shape_cast %57 : vector<1x41x128xf32> to vector<41x128xf32>
    %59 = vector.shape_cast %56 : vector<41x128xf32> to vector<1x41x128xf32>
    tpu.vector_store %arg6[%c0_75, %c0_76, %c128], %59 {strides = array<i32>} : memref<1x41x512xf32, #tpu.memory_space<vmem>>, vector<1x41x128xf32>,
    %c0_77 = arith.constant 0 : index
    %c2_78 = arith.constant 2 : index
    %c0_79 = arith.constant 0 : index
    %c0_80 = arith.constant 0 : index
    %60 = vector.load %arg2[%c0_77, %c2_78, %c0_79, %c0_80] : memref<1x4x16x144xbf16, #tpu.memory_space<vmem>>, vector<1x1x16x128xbf16>
    %61 = vector.shape_cast %60 : vector<1x1x16x128xbf16> to vector<16x128xbf16>
    %c0_81 = arith.constant 0 : index
    %c2_82 = arith.constant 2 : index
    %c0_83 = arith.constant 0 : index
    %c1_84 = arith.constant 1 : index
    %62 = vector.load %arg2[%c0_81, %c2_82, %c0_83, %c1_84] : memref<1x4x16x144xbf16, #tpu.memory_space<vmem>>, vector<1x1x16x128xbf16>
    %63 = vector.shape_cast %62 : vector<1x1x16x128xbf16> to vector<16x128xbf16>
    %c0_85 = arith.constant 0 : index
    %c2_86 = arith.constant 2 : index
    %c0_87 = arith.constant 0 : index
    %c9_88 = arith.constant 9 : index
    %64 = vector.load %arg2[%c0_85, %c2_86, %c0_87, %c9_88] : memref<1x4x16x144xbf16, #tpu.memory_space<vmem>>, vector<1x1x16x128xbf16>
    %65 = vector.shape_cast %64 : vector<1x1x16x128xbf16> to vector<16x128xbf16>
    %c0_89 = arith.constant 0 : index
    %c2_90 = arith.constant 2 : index
    %c0_91 = arith.constant 0 : index
    %c10_92 = arith.constant 10 : index
    %66 = vector.load %arg2[%c0_89, %c2_90, %c0_91, %c10_92] : memref<1x4x16x144xbf16, #tpu.memory_space<vmem>>, vector<1x1x16x128xbf16>
    %67 = vector.shape_cast %66 : vector<1x1x16x128xbf16> to vector<16x128xbf16>
    %c0_93 = arith.constant 0 : index
    %c3 = arith.constant 3 : index
    %c0_94 = arith.constant 0 : index
    %c0_95 = arith.constant 0 : index
    %68 = vector.load %arg2[%c0_93, %c3, %c0_94, %c0_95] : memref<1x4x16x144xbf16, #tpu.memory_space<vmem>>, vector<1x1x16x128xbf16>
    %69 = vector.shape_cast %68 : vector<1x1x16x128xbf16> to vector<16x128xbf16>
    %c0_96 = arith.constant 0 : index
    %c3_97 = arith.constant 3 : index
    %c0_98 = arith.constant 0 : index
    %c1_99 = arith.constant 1 : index
    %70 = vector.load %arg2[%c0_96, %c3_97, %c0_98, %c1_99] : memref<1x4x16x144xbf16, #tpu.memory_space<vmem>>, vector<1x1x16x128xbf16>
    %71 = vector.shape_cast %70 : vector<1x1x16x128xbf16> to vector<16x128xbf16>
    %c0_100 = arith.constant 0 : index
    %c3_101 = arith.constant 3 : index
    %c0_102 = arith.constant 0 : index
    %c9_103 = arith.constant 9 : index
    %72 = vector.load %arg2[%c0_100, %c3_101, %c0_102, %c9_103] : memref<1x4x16x144xbf16, #tpu.memory_space<vmem>>, vector<1x1x16x128xbf16>
    %73 = vector.shape_cast %72 : vector<1x1x16x128xbf16> to vector<16x128xbf16>
    %c0_104 = arith.constant 0 : index
    %c3_105 = arith.constant 3 : index
    %c0_106 = arith.constant 0 : index
    %c10_107 = arith.constant 10 : index
    %74 = vector.load %arg2[%c0_104, %c3_105, %c0_106, %c10_107] : memref<1x4x16x144xbf16, #tpu.memory_space<vmem>>, vector<1x1x16x128xbf16>
    %75 = vector.shape_cast %74 : vector<1x1x16x128xbf16> to vector<16x128xbf16>
    %76 = tpu.concatenate %61, %63, %65, %67, %69, %71, %73, %75 in 0 : vector<16x128xbf16>, vector<16x128xbf16>, vector<16x128xbf16>, vector<16x128xbf16>, vector<16x128xbf16>, vector<16x128xbf16>, vector<16x128xbf16>, vector<16x128xbf16> -> vector<128x128xbf16>
    %c0_108 = arith.constant 0 : index
    %c0_109 = arith.constant 0 : index
    %77 = vector.load %arg4[%c0_108, %c0_109] : memref<41x128xbf16, #tpu.memory_space<vmem>>, vector<41x128xbf16>
    %cst_110 = arith.constant dense<0.000000e+00> : vector<41x128xf32>
    %78 = tpu.matmul %77, %76, %cst_110 {dimension_numbers = #tpu.dot_dimension_numbers<[1], [0], [0], [1], [0, 0, 1, 1], [], []>} : vector<41x128xbf16>, vector<128x128xbf16>, vector<41x128xf32> -> vector<41x128xf32>
    %c0_111 = arith.constant 0 : index
    %c0_112 = arith.constant 0 : index
    %79 = vector.load %arg5[%c0_111, %c0_112] : memref<41x1xf32, #tpu.memory_space<vmem>>, vector<41x1xf32>
    %80 = vector.broadcast %79 : vector<41x1xf32> to vector<41x128xf32>
    %81 = arith.addf %78, %80 : vector<41x128xf32>
    %cst_113 = arith.constant 0.000000e+00 : f32
    %82 = vector.broadcast %cst_113 : f32 to vector<41x128xf32>
    %83 = arith.cmpf ogt, %81, %82 : vector<41x128xf32>
    %cst_114 = arith.constant -8.000000e-02 : f32
    %84 = vector.broadcast %cst_114 : f32 to vector<41x128xf32>
    %85 = arith.mulf %81, %84 : vector<41x128xf32>
    %86 = arith.select %83, %81, %85 : vector<41x128xi1>, vector<41x128xf32>
    %c0_115 = arith.constant 0 : index
    %c0_116 = arith.constant 0 : index
    %c256 = arith.constant 256 : index
    %87 = vector.load %arg6[%c0_115, %c0_116, %c256] : memref<1x41x512xf32, #tpu.memory_space<vmem>>, vector<1x41x128xf32>
    %88 = vector.shape_cast %87 : vector<1x41x128xf32> to vector<41x128xf32>
    %89 = vector.shape_cast %86 : vector<41x128xf32> to vector<1x41x128xf32>
    tpu.vector_store %arg6[%c0_115, %c0_116, %c256], %89 {strides = array<i32>} : memref<1x41x512xf32, #tpu.memory_space<vmem>>, vector<1x41x128xf32>,
    %c0_117 = arith.constant 0 : index
    %c3_118 = arith.constant 3 : index
    %c0_119 = arith.constant 0 : index
    %c0_120 = arith.constant 0 : index
    %90 = vector.load %arg2[%c0_117, %c3_118, %c0_119, %c0_120] : memref<1x4x16x144xbf16, #tpu.memory_space<vmem>>, vector<1x1x16x128xbf16>
    %91 = vector.shape_cast %90 : vector<1x1x16x128xbf16> to vector<16x128xbf16>
    %c0_121 = arith.constant 0 : index
    %c3_122 = arith.constant 3 : index
    %c0_123 = arith.constant 0 : index
    %c1_124 = arith.constant 1 : index
    %92 = vector.load %arg2[%c0_121, %c3_122, %c0_123, %c1_124] : memref<1x4x16x144xbf16, #tpu.memory_space<vmem>>, vector<1x1x16x128xbf16>
    %93 = vector.shape_cast %92 : vector<1x1x16x128xbf16> to vector<16x128xbf16>
    %c0_125 = arith.constant 0 : index
    %c3_126 = arith.constant 3 : index
    %c0_127 = arith.constant 0 : index
    %c9_128 = arith.constant 9 : index
    %94 = vector.load %arg2[%c0_125, %c3_126, %c0_127, %c9_128] : memref<1x4x16x144xbf16, #tpu.memory_space<vmem>>, vector<1x1x16x128xbf16>
    %95 = vector.shape_cast %94 : vector<1x1x16x128xbf16> to vector<16x128xbf16>
    %c0_129 = arith.constant 0 : index
    %c3_130 = arith.constant 3 : index
    %c0_131 = arith.constant 0 : index
    %c10_132 = arith.constant 10 : index
    %96 = vector.load %arg2[%c0_129, %c3_130, %c0_131, %c10_132] : memref<1x4x16x144xbf16, #tpu.memory_space<vmem>>, vector<1x1x16x128xbf16>
    %97 = vector.shape_cast %96 : vector<1x1x16x128xbf16> to vector<16x128xbf16>
    %c0_133 = arith.constant 0 : index
    %c0_134 = arith.constant 0 : index
    %c0_135 = arith.constant 0 : index
    %c0_136 = arith.constant 0 : index
    %98 = vector.load %arg3[%c0_133, %c0_134, %c0_135, %c0_136] : memref<1x1x16x144xbf16, #tpu.memory_space<vmem>>, vector<1x1x16x128xbf16>
    %99 = vector.shape_cast %98 : vector<1x1x16x128xbf16> to vector<16x128xbf16>
    %c0_137 = arith.constant 0 : index
    %c0_138 = arith.constant 0 : index
    %c0_139 = arith.constant 0 : index
    %c1_140 = arith.constant 1 : index
    %100 = vector.load %arg3[%c0_137, %c0_138, %c0_139, %c1_140] : memref<1x1x16x144xbf16, #tpu.memory_space<vmem>>, vector<1x1x16x128xbf16>
    %101 = vector.shape_cast %100 : vector<1x1x16x128xbf16> to vector<16x128xbf16>
    %c0_141 = arith.constant 0 : index
    %c0_142 = arith.constant 0 : index
    %c0_143 = arith.constant 0 : index
    %c9_144 = arith.constant 9 : index
    %102 = vector.load %arg3[%c0_141, %c0_142, %c0_143, %c9_144] : memref<1x1x16x144xbf16, #tpu.memory_space<vmem>>, vector<1x1x16x128xbf16>
    %103 = vector.shape_cast %102 : vector<1x1x16x128xbf16> to vector<16x128xbf16>
    %c0_145 = arith.constant 0 : index
    %c0_146 = arith.constant 0 : index
    %c0_147 = arith.constant 0 : index
    %c10_148 = arith.constant 10 : index
    %104 = vector.load %arg3[%c0_145, %c0_146, %c0_147, %c10_148] : memref<1x1x16x144xbf16, #tpu.memory_space<vmem>>, vector<1x1x16x128xbf16>
    %105 = vector.shape_cast %104 : vector<1x1x16x128xbf16> to vector<16x128xbf16>
    %106 = tpu.concatenate %91, %93, %95, %97, %99, %101, %103, %105 in 0 : vector<16x128xbf16>, vector<16x128xbf16>, vector<16x128xbf16>, vector<16x128xbf16>, vector<16x128xbf16>, vector<16x128xbf16>, vector<16x128xbf16>, vector<16x128xbf16> -> vector<128x128xbf16>
    %c0_149 = arith.constant 0 : index
    %c0_150 = arith.constant 0 : index
    %107 = vector.load %arg4[%c0_149, %c0_150] : memref<41x128xbf16, #tpu.memory_space<vmem>>, vector<41x128xbf16>
    %cst_151 = arith.constant dense<0.000000e+00> : vector<41x128xf32>
    %108 = tpu.matmul %107, %106, %cst_151 {dimension_numbers = #tpu.dot_dimension_numbers<[1], [0], [0], [1], [0, 0, 1, 1], [], []>} : vector<41x128xbf16>, vector<128x128xbf16>, vector<41x128xf32> -> vector<41x128xf32>
    %c0_152 = arith.constant 0 : index
    %c0_153 = arith.constant 0 : index
    %109 = vector.load %arg5[%c0_152, %c0_153] : memref<41x1xf32, #tpu.memory_space<vmem>>, vector<41x1xf32>
    %110 = vector.broadcast %109 : vector<41x1xf32> to vector<41x128xf32>
    %111 = arith.addf %108, %110 : vector<41x128xf32>
    %cst_154 = arith.constant 0.000000e+00 : f32
    %112 = vector.broadcast %cst_154 : f32 to vector<41x128xf32>
    %113 = arith.cmpf ogt, %111, %112 : vector<41x128xf32>
    %cst_155 = arith.constant -8.000000e-02 : f32
    %114 = vector.broadcast %cst_155 : f32 to vector<41x128xf32>
    %115 = arith.mulf %111, %114 : vector<41x128xf32>
    %116 = arith.select %113, %111, %115 : vector<41x128xi1>, vector<41x128xf32>
    %c0_156 = arith.constant 0 : index
    %c0_157 = arith.constant 0 : index
    %c384 = arith.constant 384 : index
    %117 = vector.load %arg6[%c0_156, %c0_157, %c384] : memref<1x41x512xf32, #tpu.memory_space<vmem>>, vector<1x41x128xf32>
    %118 = vector.shape_cast %117 : vector<1x41x128xf32> to vector<41x128xf32>
    %119 = vector.shape_cast %116 : vector<41x128xf32> to vector<1x41x128xf32>
    tpu.vector_store %arg6[%c0_156, %c0_157, %c384], %119 {strides = array<i32>} : memref<1x41x512xf32, #tpu.memory_space<vmem>>, vector<1x41x128xf32>,
    return
  }
  func.func @transform_0(%arg0: i32, %arg1: i32) -> (i32, i32, i32, i32) {
    %c0_i32 = arith.constant 0 : i32
    %c0_i32_0 = arith.constant 0 : i32
    %c0_i32_1 = arith.constant 0 : i32
    return %arg0, %arg1, %c0_i32, %c0_i32_0 : i32, i32, i32, i32
  }
  func.func @transform_1(%arg0: i32, %arg1: i32) -> (i32, i32, i32, i32) {
    %c4_i32 = arith.constant 4 : i32
    %0 = arith.muli %arg1, %c4_i32 : i32
    %c4_i32_0 = arith.constant 4 : i32
    %1 = arith.addi %0, %c4_i32_0 : i32
    %c0_i32 = arith.constant 0 : i32
    %c0_i32_1 = arith.constant 0 : i32
    %c0_i32_2 = arith.constant 0 : i32
    return %arg0, %1, %c0_i32, %c0_i32_1 : i32, i32, i32, i32
  }
  func.func @transform_2(%arg0: i32, %arg1: i32) -> (i32, i32) {
    %c0_i32 = arith.constant 0 : i32
    %c0_i32_0 = arith.constant 0 : i32
    %c0_i32_1 = arith.constant 0 : i32
    return %c0_i32, %c0_i32_0 : i32, i32
  }
  func.func @transform_3(%arg0: i32, %arg1: i32) -> (i32, i32) {
    %c0_i32 = arith.constant 0 : i32
    %c0_i32_0 = arith.constant 0 : i32
    %c0_i32_1 = arith.constant 0 : i32
    return %c0_i32, %c0_i32_0 : i32, i32
  }
  func.func @transform_4(%arg0: i32, %arg1: i32) -> (i32, i32, i32) {
    %c0_i32 = arith.constant 0 : i32
    %c0_i32_0 = arith.constant 0 : i32
    return %arg0, %c0_i32, %arg1 : i32, i32, i32
  }
}

</mosaic_0001>

<bundles_post_ra>
// kernel: _lambda_.1
= control target key start
LH: loop header
LB: loop body
LE: loop exit
PB: predicated region body
PF: predicated region fallthrough
CT: control target
= control target key end

     0   :  { %s1572_s15 = smov 0   ;;  %s1574_s16 = smov 0   ;;  %s2004_s0 = inlined_call_operand.vmem [shape: bf16[2,9,16,144], index: 0, kind: input, shape index: {}, may-alias: {0,1}]   ;;  %s2005_s1 = inlined_call_operand.vmem [shape: bf16[2,9,16,144], index: 1, kind: input, shape index: {}, may-alias: {0,1}]   ;;  %s2006_s2 = inlined_call_operand.vmem [shape: bf16[41,128], index: 2, kind: input, shape index: {}]   ;;  %s2007_s3 = inlined_call_operand.vmem [shape: f32[41,1], index: 3, kind: input, shape index: {}]   ;;  %s2008_s4 = inlined_call_operand.vmem [shape: f32[2,41,1024], index: 4, kind: output, shape index: {}]  }
   0x1   :  { %s1576_s17 = smov 0   ;;  %s1578_s18 = smov 0  }
   0x2   :  { %s1580_s19 = smov 0   ;;  %s1582_s20 = smov 0  }
   0x3   :  { %s1584_s21 = smov 0  }
   0x4 LB: > { %s23_s22 = sadd.s32 1, %s1533_s19  ;;  %s26_s23 = sadd.s32 1, %s1537_s20  ;;  %s1541_s21 = sphi %s1584_s21, %s14_s21   ;;  %s1537_s20 = sphi %s1582_s20, %s2015_s20   ;;  %s1533_s19 = sphi %s1580_s19, %s2014_s19   ;;  %s1529_s18 = sphi %s1578_s18, %s2013_s18   ;;  %s1525_s17 = sphi %s1576_s17, %s2012_s17   ;;  %s1521_s16 = sphi %s1574_s16, %s2011_s16   ;;  %s1517_s15 = sphi %s1572_s15, %s2010_s15  }
   0x5   : > { %p24_p0 = scmp.ge.s32.totalorder %s23_s22, 2  ;;  %s1200_s24 = sadd.s32 4294967295, %s1541_s21  }
   0x6   : > { %p147_p1 = scmp.ne.s32.totalorder %s1521_s16, %s1517_s15  ;;  %p148_p2 = scmp.eq.s32.totalorder %s1200_s24, 3 }
   0x7   : > { %s2017_s22 = smov (%p24_p0, %s23_s22), 0  ;;  %s2019_s23 = smov (!%p24_p0, %s26_s23), %s1537_s20 }
   0x8   : > { %s133_s25 = ssub.s32 %s1533_s19, %s2017_s22  ;;  %p28_p3 = scmp.ge.s32.totalorder %s2019_s23, 2 }
   0x9   : > { %p1206_p4 = scmp.ge.s32.totalorder %s1541_s21, 1  ;;  %p1616_p5 = por %p148_p2, %p147_p1 }
   0xa   : > { %p220_p6 = scmp.lt.s32.totalorder %s1541_s21, 5  ;;  %s2021_s23 = smov (%p28_p3, %s2019_s23), 0 }
   0xb   : > { %s132_s27 = ssub.s32 %s1537_s20, %s2021_s23  ;;  %s137_s29 = sadd.s32 1, %s1521_s16 }
   0xc   : > { %p221_p7 = pnand %p1206_p4, %p220_p6  ;;  %s134_s28 = sor.u32 %s133_s25, %s132_s27 }
   0xd   : > { %p135_p8 = scmp.eq.s32.totalorder %s134_s28, 0  ;;  %s1629_s5 = sshll.u32 (!%p221_p7), %s1525_s17, 2 }
   0xe   : > { %224 = sbr.rel (%p221_p7) target bundleno = 460 (0x1cc), region = 36  ;;  %p274_p9 = scmp.lt.s32.totalorder (!%p221_p7), %s1529_s18, 1 }
   0xf   : > { %s1627_s30 = scalar_select %p135_p8, %s1521_s16, %s137_s29  }
  0x10   : > { %p276_p10 = scmp.lt.s32.totalorder (!%p221_p7), %s1629_s5, 8  ;;  %s1544_s17 = smov (!%p221_p7), 119  }
  0x11   : > { %s1545_s24 = smov (!%p221_p7), 127   ;;  %s1546_s25 = smov (!%p221_p7), 118  }
  0x12   : > { %s291_s27 = sadd.s32 (!%p221_p7), 4, %s1629_s5 }
  0x13   : > { %s1634_s6 = scalar_select %p274_p9, %s1529_s18, 1  ;;  %v1543_v0 = vmov 0   ;;  %v1675_v18 = vld [vmem:[%s2007_s3] sm:$0xff]  ;;  %v1741_v59 = vld [vmem:[%s2007_s3 + $0x10] sm:$0xff]  ;;  %v391_v63 = vld [vmem:[%s2007_s3 + $0x28] sm:$0x1] }
  0x14   : > { %s277_s7 = scalar_select %p276_p10, %s1629_s5, 8  ;;  %1484 = vset.pattern.permute.xlu0 %v1543_v0  ;;  %1486 = vset.pattern.permute.xlu1 %v1543_v0  ;;  %vm345_vm0 = vcmask 965632   ;;  %vm338_vm1 = vcmask 973824   ;;  %vm331_vm2 = vcmask 1039360  }
  0x15   : > { %s1422_s8 = smul.u32 36, %s1634_s6  ;;  %1485 = vset.pattern.permute.xlu2 %v1543_v0  ;;  %p294_p11 = scmp.lt.s32.totalorder %s291_s27, 8 }
  0x16   : > { %s1208_s9 = sshll.u32 %s277_s7, 2 }
  0x17   : > { %s280_s10 = sadd.s32 %s1422_s8, %s1208_s9  ;;  %s2023_s27 = smov (!%p294_p11, %s291_s27), 8 }
  0x18   : > { %s1209_s11 = sshll.u32 %s280_s10, 2  ;;  %s1211_s28 = sshll.u32 %s2023_s27, 2 }
  0x19   : > { %s1643_s14 = scalar_lea.vmem %s2004_s0, %s1209_s11  ;;  %s298_s29 = sadd.s32 %s1422_s8, %s1211_s28 }
  0x1a   : > { %v1223_v1 = vld [vmem:[%s1643_s14] sm:$0xf]  ;;  %v1387_v2 = vld [vmem:[%s1643_s14 + $0x4] sm:$0xf0]  ;;  %v1386_v4 = vld [vmem:[%s1643_s14 + $0x4] sm:$0xf] }
  0x1b   : > { %v1224_v3 = vor.u32 %v1387_v2, %v1223_v1  ;;  %v1225_v5 = vld [vmem:[%s1643_s14 + $0x8] sm:$0xf0]  ;;  %v1389_v7 = vld [vmem:[%s1643_s14 + $0x14] sm:$0xf]  ;;  %v1237_v8 = vld [vmem:[%s1643_s14 + $0x18] sm:$0xf0] }
  0x1c   : > { %v1228_v6 = vor.u32 %v1386_v4, %v1225_v5  ;;  %v1235_v9 = vld [vmem:[%s1643_s14 + $0x10] sm:$0xf]  ;;  %v1390_v10 = vld [vmem:[%s1643_s14 + $0x14] sm:$0xf0]  ;;  %v1240_v11 = vor.u32 %v1389_v7, %v1237_v8  ;;  %s1212_s7 = sshll.u32 %s298_s29, 2 }
  0x1d   : > { %334 = vrot.lane.b32.xlu1 %v1224_v3, %s1544_s17  ;;  %327 = vrot.lane.b32.xlu0 %v1224_v3, %s1545_s24  ;;  %v1236_v12 = vor.u32 %v1390_v10, %v1235_v9  ;;  %v1323_v13 = vld [vmem:[%s1643_s14 + $0x30] sm:$0xf]  ;;  %v1408_v14 = vld [vmem:[%s1643_s14 + $0x34] sm:$0xf0]  ;;  %s1680_s13 = scalar_lea.vmem %s2005_s1, %s1212_s7 }
  0x1e   : > { %341 = vrot.lane.b32.xlu2 %v1224_v3, %s1546_s25  ;;  %v1324_v15 = vor.u32 %v1408_v14, %v1323_v13  ;;  %v1407_v16 = vld [vmem:[%s1643_s14 + $0x34] sm:$0xf]  ;;  %v1325_v17 = vld [vmem:[%s1643_s14 + $0x38] sm:$0xf0]  ;;  %v1363_v20 = vld [vmem:[%s1680_s13] sm:$0xf] }
  0x1f   : > { %v1328_v19 = vor.u32 %v1407_v16, %v1325_v17  ;;  %v1417_v21 = vld [vmem:[%s1680_s13 + $0x4] sm:$0xf0]  ;;  %v1416_v23 = vld [vmem:[%s1680_s13 + $0x4] sm:$0xf]  ;;  %v1365_v24 = vld [vmem:[%s1680_s13 + $0x8] sm:$0xf0] }
  0x20   : > { %v1364_v22 = vor.u32 %v1417_v21, %v1363_v20  ;;  %v1368_v25 = vor.u32 %v1416_v23, %v1365_v24  ;;  %v1279_v26 = vld [vmem:[%s1643_s14 + $0x20] sm:$0xf]  ;;  %v1399_v27 = vld [vmem:[%s1643_s14 + $0x24] sm:$0xf0]  ;;  %v1398_v28 = vld [vmem:[%s1643_s14 + $0x24] sm:$0xf] }
  0x21   : > { %v1281_v29 = vld [vmem:[%s1643_s14 + $0x28] sm:$0xf0]  ;;  %v1280_v30 = vor.u32 %v1399_v27, %v1279_v26  ;;  %v1404_v32 = vld [vmem:[%s1643_s14 + $0x24] sm:$0xf]  ;;  %v1311_v35 = vld [vmem:[%s1643_s14 + $0x20] sm:$0xf] }
  0x22   : > { %v1284_v31 = vor.u32 %v1398_v28, %v1281_v29  ;;  %v1313_v33 = vld [vmem:[%s1643_s14 + $0x28] sm:$0xf0]  ;;  %v1405_v36 = vld [vmem:[%s1643_s14 + $0x24] sm:$0xf0]  ;;  %v1351_v38 = vld [vmem:[%s1643_s14 + $0x30] sm:$0xf] }
  0x23   : > { %v1316_v34 = vor.u32 %v1404_v32, %v1313_v33  ;;  %v1312_v37 = vor.u32 %v1405_v36, %v1311_v35  ;;  %v1414_v39 = vld [vmem:[%s1643_s14 + $0x34] sm:$0xf0]  ;;  %v1413_v41 = vld [vmem:[%s1643_s14 + $0x34] sm:$0xf]  ;;  %v1353_v42 = vld [vmem:[%s1643_s14 + $0x38] sm:$0xf0] }
  0x24   : > { %v1352_v40 = vor.u32 %v1414_v39, %v1351_v38  ;;  %v1356_v43 = vor.u32 %v1413_v41, %v1353_v42  ;;  %v1267_v45 = vld [vmem:[%s1643_s14 + $0x10] sm:$0xf]  ;;  %v1396_v46 = vld [vmem:[%s1643_s14 + $0x14] sm:$0xf0]  ;;  %v1395_v47 = vld [vmem:[%s1643_s14 + $0x14] sm:$0xf] }
  0x25   : > { %336 = vrot.lane.b32.xlu1 %v1228_v6, %s1544_s17  ;;  %329 = vrot.lane.b32.xlu0 %v1228_v6, %s1545_s24  ;;  %v1269_v48 = vld [vmem:[%s1643_s14 + $0x18] sm:$0xf0]  ;;  %v1268_v50 = vor.u32 %v1396_v46, %v1267_v45  ;;  %v1231_v5 = vld [vmem:[%s1643_s14 + $0x10] sm:$0xf] }
  0x26   : > { %343 = vrot.lane.b32.xlu2 %v1228_v6, %s1546_s25  ;;  %v1272_v51 = vor.u32 %v1395_v47, %v1269_v48  ;;  %v1388_v6 = vld [vmem:[%s1643_s14 + $0x14] sm:$0xf0]  ;;  %v1219_v20 = vld [vmem:[%s1643_s14] sm:$0xf]  ;;  %v1385_v21 = vld [vmem:[%s1643_s14 + $0x4] sm:$0xf0] }
  0x27   : > { %v1220_v28 = vor.u32 %v1385_v21, %v1219_v20  ;;  %v753_v29 = vld [vmem:[%s2007_s3 + $0x28] sm:$0x1]  ;;  %v1779_v35 = vld [vmem:[%s2007_s3 + $0x18] sm:$0xff]  ;;  %v1319_v36 = vld [vmem:[%s1643_s14 + $0x30] sm:$0xf] }
  0x28   : > { %v1415_v41 = vld [vmem:[%s1680_s13 + $0x4] sm:$0xf0] }
  0x29   : > { %v1792_v45 = vld [vmem:[%s2007_s3 + $0x8] sm:$0xff] }
  0x2a   : > { %v933_v46 = vld [vmem:[%s2007_s3 + $0x28] sm:$0x1] }
  0x2d   : > { %364 = vrot.lane.b32.xlu1 %v1240_v11, %s1545_s24  ;;  %362 = vrot.lane.b32.xlu0 %v1236_v12, %s1545_s24 }
  0x2e   : > { %368 = vrot.lane.b32.xlu2 %v1236_v12, %s1544_s17 }
  0x35   : > { %374 = vrot.lane.b32.xlu1 %v1236_v12, %s1546_s25  ;;  %370 = vrot.lane.b32.xlu0 %v1240_v11, %s1544_s17  ;;  %v572_v12 = vld [vmem:[%s2007_s3 + $0x28] sm:$0x1] }
  0x36   : > { %376 = vrot.lane.b32.xlu2 %v1240_v11, %s1546_s25  ;;  %v1232_v11 = vor.u32 %v1388_v6, %v1231_v5 }
  0x3d   : > { %736 = vrot.lane.b32.xlu1 %v1324_v15, %s1546_s25  ;;  %394 = vperm.xlu0 %1484, %v1675_v18  }
  0x3e   : > { %738 = vrot.lane.b32.xlu2 %v1328_v19, %s1546_s25 }
  0x45   : > { %916 = vrot.lane.b32.xlu1 %v1364_v22, %s1546_s25  ;;  %730 = vrot.lane.b32.xlu0 %v1324_v15, %s1544_s17 }
  0x46   : > { %918 = vrot.lane.b32.xlu2 %v1368_v25, %s1546_s25 }
  0x4d   : > { %732 = vrot.lane.b32.xlu1 %v1328_v19, %s1544_s17  ;;  %912 = vrot.lane.b32.xlu0 %v1368_v25, %s1544_s17 }
  0x4e   : > { %910 = vrot.lane.b32.xlu2 %v1364_v22, %s1544_s17 }
  0x55   : > { %555 = vrot.lane.b32.xlu1 %v1280_v30, %s1546_s25  ;;  %724 = vrot.lane.b32.xlu0 %v1324_v15, %s1545_s24 }
  0x56   : > { %557 = vrot.lane.b32.xlu2 %v1284_v31, %s1546_s25 }
  0x5d   : > { %726 = vrot.lane.b32.xlu1 %v1328_v19, %s1545_s24  ;;  %906 = vrot.lane.b32.xlu0 %v1368_v25, %s1545_s24 }
  0x5e   : > { %904 = vrot.lane.b32.xlu2 %v1364_v22, %s1545_s24 }
  0x65   : > { %549 = vrot.lane.b32.xlu1 %v1280_v30, %s1544_s17  ;;  %543 = vrot.lane.b32.xlu0 %v1280_v30, %s1545_s24  ;;  %v1391_v30 = vld [vmem:[%s2006_s2] sm:$0xff] }
  0x66   : > { %551 = vrot.lane.b32.xlu2 %v1284_v31, %s1544_s17 }
  0x6d   : > { %545 = vrot.lane.b32.xlu1 %v1284_v31, %s1545_s24  ;;  %706 = vrot.lane.b32.xlu0 %v1316_v34, %s1546_s25 }
  0x6e   : > { %704 = vrot.lane.b32.xlu2 %v1312_v37, %s1546_s25 }
  0x75   : > { %884 = vrot.lane.b32.xlu1 %v1352_v40, %s1546_s25  ;;  %698 = vrot.lane.b32.xlu0 %v1312_v37, %s1544_s17 }
  0x76   : > { %886 = vrot.lane.b32.xlu2 %v1356_v43, %s1546_s25 }
  0x78   : > { %v342_v44 = vpop.permute.xlu2 %341 }
  0x7d   : > { %700 = vrot.lane.b32.xlu1 %v1316_v34, %s1544_s17  ;;  %880 = vrot.lane.b32.xlu0 %v1356_v43, %s1544_s17 }
  0x7e   : > { %878 = vrot.lane.b32.xlu2 %v1352_v40, %s1544_s17 }
  0x80   : > { %v344_v49 = vpop.permute.xlu2 %343 }
  0x81   : > { %v346_v16 = vsel %vm345_vm0, %v342_v44, %v344_v49  ;;  %v1392_v49 = vld [vmem:[%s2006_s2 + $0x8] sm:$0xff] }
  0x85   : > { %523 = vrot.lane.b32.xlu1 %v1268_v50, %s1546_s25  ;;  %692 = vrot.lane.b32.xlu0 %v1312_v37, %s1545_s24  ;;  %v1406_v37 = vld [vmem:[%s1643_s14 + $0x34] sm:$0xf0] }
  0x86   : > { %525 = vrot.lane.b32.xlu2 %v1272_v51, %s1546_s25  ;;  %v1320_v44 = vor.u32 %v1406_v37, %v1319_v36  ;;  %v1400_v36 = vld [vmem:[%s2006_s2] sm:$0xff]  ;;  %v1410_v37 = vld [vmem:[%s2006_s2 + $0x8] sm:$0xff] }
  0x88   : > { %v369_v52 = vpop.permute.xlu2 %368 }
  0x8d   : > { %694 = vrot.lane.b32.xlu1 %v1316_v34, %s1545_s24  ;;  %874 = vrot.lane.b32.xlu0 %v1356_v43, %s1545_s24 }
  0x8e   : > { %872 = vrot.lane.b32.xlu2 %v1352_v40, %s1545_s24  ;;  %v1359_v40 = vld [vmem:[%s1680_s13] sm:$0xf] }
  0x8f   : > { %v335_v53 = vpop.permute.xlu1 %334  ;;  %v328_v54 = vpop.permute.xlu0 %327  ;;  %v1360_v48 = vor.u32 %v1415_v41, %v1359_v40  ;;  %v1411_v40 = vld [vmem:[%s2006_s2 + $0x10] sm:$0x10]  ;;  %v1379_v41 = vld [vmem:[%s2006_s2 + $0x10] sm:$0xf] }
  0x90   : > { %v377_v55 = vpop.permute.xlu2 %376 }
  0x95   : > { %517 = vrot.lane.b32.xlu1 %v1268_v50, %s1544_s17  ;;  %511 = vrot.lane.b32.xlu0 %v1268_v50, %s1545_s24 }
  0x96   : > { %519 = vrot.lane.b32.xlu2 %v1272_v51, %s1544_s17 }
  0x97   : > { %v337_v56 = vpop.permute.xlu1 %336  ;;  %v330_v57 = vpop.permute.xlu0 %329 }
  0x98   : > { %v739_v58 = vpop.permute.xlu2 %738  ;;  %v339_v19 = vsel %vm338_vm1, %v335_v53, %v337_v56  ;;  %v332_v25 = vsel %vm331_vm2, %v328_v54, %v330_v57  ;;  %v1806_v53 = vld [vmem:[%s2007_s3 + $0x20] sm:$0xff]  ;;  %v1397_v56 = vld [vmem:[%s1643_s14 + $0x24] sm:$0xf0] }
  0x9d   : > { %513 = vrot.lane.b32.xlu1 %v1272_v51, %s1545_s24  ;;  %404 = vperm.xlu0 %1484, %v1741_v59   ;;  %s264_s24 = sand.u32 1, %s1517_s15   ;;  %s1423_s15 = smul.u32 (%p1616_p5), 48, %s1529_s18 }
  0x9e   : > { %399 = vperm.xlu2 %1485, %v1792_v45  }
  0x9f   : > { %v365_v60 = vpop.permute.xlu1 %364  ;;  %v363_v61 = vpop.permute.xlu0 %362  ;;  %s1039_s29 = sadd.s32 (%p1616_p5), %s1423_s15, %s1629_s5 }
  0xa0   : > { %v919_v62 = vpop.permute.xlu2 %918  ;;  %v366_v9 = vsel %vm331_vm2, %v363_v61, %v365_v60  ;;  %v1251_v61 = vld [vmem:[%s2006_s2 + $0x10] sm:$0xf]  ;;  %s1382_s7 = sshll.u32 (%p1616_p5), %s1039_s29, 3 }
  0xa1   : > { %s1935_s26 = scalar_lea.vmem (%p1616_p5), %s2008_s4, %s1382_s7 }
  0xa5   : > { %419 = vperm.xlu0 %1484, %v391_v63   ;;  %409 = vperm.xlu1 %1486, %v1779_v35  }
  0xa6   : > { %414 = vperm.xlu2 %1485, %v1806_v53  }
  0xa7   : > { %v375_v0 = vpop.permute.xlu1 %374  ;;  %v371_v1 = vpop.permute.xlu0 %370 }
  0xa8   : > { %v378_v2 = vsel %vm345_vm0, %v375_v0, %v377_v55  ;;  %v911_v3 = vpop.permute.xlu2 %910  ;;  %v372_v4 = vsel %vm338_vm1, %v369_v52, %v371_v1  ;;  %v1275_v55 = vld [vmem:[%s1643_s14 + $0x20] sm:$0xf] }
  0xa9   : > { %440 = vmatpush.bf16.msra.mxu0 %v378_v2  ;;  %v1276_v63 = vor.u32 %v1397_v56, %v1275_v55 }
  0xad   : > { %585 = vperm.xlu0 %1484, %v1741_v59   ;;  %441 = vmatpush.bf16.msra.mxu0 %v372_v4 }
  0xae   : > { %575 = vperm.xlu1 %1486, %v1675_v18   ;;  %580 = vperm.xlu2 %1485, %v1792_v45  }
  0xaf   : > { %v737_v7 = vpop.permute.xlu1 %736  ;;  %v1753_v8 = vpop.permute.xlu0 %394 }
  0xb0   : > { %v740_v10 = vsel %vm345_vm0, %v737_v7, %v739_v58  ;;  %v558_v13 = vpop.permute.xlu2 %557 }
  0xb1   : > { %442 = vmatpush.bf16.msra.mxu0 %v366_v9  ;;  %802 = vmatpush.bf16.msra.mxu2 %v740_v10 }
  0xb5   : > { %600 = vperm.xlu0 %1484, %v572_v12   ;;  %443 = vmatpush.bf16.msra.mxu0 %v1232_v11 }
  0xb6   : > { %590 = vperm.xlu1 %1486, %v1779_v35   ;;  %595 = vperm.xlu2 %1485, %v1806_v53  }
  0xb7   : > { %v917_v14 = vpop.permute.xlu1 %916  ;;  %v731_v15 = vpop.permute.xlu0 %730 }
  0xb8   : > { %v920_v17 = vsel %vm345_vm0, %v917_v14, %v919_v62  ;;  %v905_v22 = vpop.permute.xlu2 %904  ;;  %v1393_v62 = vld [vmem:[%s2006_s2 + $0x10] sm:$0x10] }
  0xb9   : > { %444 = vmatpush.bf16.msra.mxu0 %v346_v16  ;;  %982 = vmatpush.bf16.msra.mxu3 %v920_v17  ;;  %v1252_v0 = vor.u32 %v1393_v62, %v1251_v61  ;;  %v1403_v16 = vld [vmem:[%s1643_s14 + $0x24] sm:$0xf0]  ;;  %v1347_v17 = vld [vmem:[%s1643_s14 + $0x30] sm:$0xf] }
  0xbd   : > { %766 = vperm.xlu0 %1484, %v1741_v59   ;;  %445 = vmatpush.bf16.msra.mxu0 %v339_v19  ;;  %v1412_v19 = vld [vmem:[%s1643_s14 + $0x34] sm:$0xf0] }
  0xbe   : > { %756 = vperm.xlu1 %1486, %v1675_v18   ;;  %761 = vperm.xlu2 %1485, %v1792_v45  }
  0xbf   : > { %v733_v23 = vpop.permute.xlu1 %732  ;;  %v913_v24 = vpop.permute.xlu0 %912 }
  0xc0   : > { %v734_v26 = vsel %vm338_vm1, %v731_v15, %v733_v23  ;;  %v914_v27 = vsel %vm338_vm1, %v911_v3, %v913_v24  ;;  %v552_v34 = vpop.permute.xlu2 %551  ;;  %v1307_v15 = vld [vmem:[%s1643_s14 + $0x20] sm:$0xf]  ;;  %v1348_v24 = vor.u32 %v1412_v19, %v1347_v17 }
  0xc1   : > { %446 = vmatpush.bf16.msra.mxu0 %v332_v25  ;;  %803 = vmatpush.bf16.msra.mxu2 %v734_v26  ;;  %v1308_v23 = vor.u32 %v1403_v16, %v1307_v15  ;;  %v1409_v25 = vld [vmem:[%s2006_s2] sm:$0xff] }
  0xc2   : > { %983 = vmatpush.bf16.msra.mxu3 %v914_v27  ;;  %v1418_v26 = vld [vmem:[%s2006_s2] sm:$0xff] }
  0xc5   : > { %781 = vperm.xlu0 %1484, %v753_v29   ;;  %447 = vmatpush.bf16.msra.mxu0 %v1220_v28 }
  0xc6   : > { %771 = vperm.xlu1 %1486, %v1779_v35   ;;  %776 = vperm.xlu2 %1485, %v1806_v53  }
  0xc7   : > { %v556_v31 = vpop.permute.xlu1 %555  ;;  %v725_v32 = vpop.permute.xlu0 %724 }
  0xc8   : > { %448 = vmatmul.bf16.vlgmr.msra.gmra.mxu0 %v1391_v30  ;;  %v559_v33 = vsel %vm345_vm0, %v556_v31, %v558_v13  ;;  %v705_v47 = vpop.permute.xlu2 %704  ;;  %v1263_v30 = vld [vmem:[%s1643_s14 + $0x10] sm:$0xf]  ;;  %v1394_v31 = vld [vmem:[%s1643_s14 + $0x14] sm:$0xf0]  ;;  %s1421_s14 = smul.u32 192, %s264_s24 }
  0xc9   : > { %621 = vmatpush.bf16.msra.mxu1 %v559_v33 }
  0xca   : > { %s1882_s28 = scalar_lea.vmem [#allocation2], %s1421_s14 }
  0xcd   : > { %946 = vperm.xlu0 %1484, %v1741_v59  }
  0xce   : > { %936 = vperm.xlu1 %1486, %v1675_v18   ;;  %941 = vperm.xlu2 %1485, %v1792_v45  }
  0xcf   : > { %v727_v38 = vpop.permute.xlu1 %726  ;;  %v907_v39 = vpop.permute.xlu0 %906 }
  0xd0   : > { %v728_v42 = vsel %vm331_vm2, %v725_v32, %v727_v38  ;;  %v908_v43 = vsel %vm331_vm2, %v905_v22, %v907_v39  ;;  %v887_v54 = vpop.permute.xlu2 %886  ;;  %v1419_v38 = vld [vmem:[%s2006_s2 + $0x8] sm:$0xff]  ;;  %v1339_v39 = vld [vmem:[%s2006_s2 + $0x10] sm:$0xf] }
  0xd1   : > { %804 = vmatpush.bf16.msra.mxu2 %v728_v42  ;;  %984 = vmatpush.bf16.msra.mxu3 %v908_v43  ;;  %v1420_v42 = vld [vmem:[%s2006_s2 + $0x10] sm:$0x10]  ;;  %v1401_v43 = vld [vmem:[%s2006_s2 + $0x8] sm:$0xff] }
  0xd2   : > { %v1380_v45 = vor.u32 %v1420_v42, %v1379_v41 }
  0xd5   : > { %961 = vperm.xlu0 %1484, %v933_v46   ;;  %805 = vmatpush.bf16.msra.mxu2 %v1320_v44  ;;  %v1340_v44 = vor.u32 %v1411_v40, %v1339_v39  ;;  %v1295_v46 = vld [vmem:[%s2006_s2 + $0x10] sm:$0xf] }
  0xd6   : > { %985 = vmatpush.bf16.msra.mxu3 %v1360_v48  ;;  %951 = vperm.xlu1 %1486, %v1779_v35   ;;  %v1264_v35 = vor.u32 %v1394_v31, %v1263_v30 }
  0xd7   : > { %v550_v50 = vpop.permute.xlu1 %549  ;;  %v544_v51 = vpop.permute.xlu0 %543  ;;  %956 = vperm.xlu2 %1485, %v1806_v53  }
  0xd8   : > { %453 = vmatmul.bf16.gmra.mxu0 %v1392_v49  ;;  %v553_v52 = vsel %vm338_vm1, %v550_v50, %v552_v34  ;;  %v879_v1 = vpop.permute.xlu2 %878 }
  0xd9   : > { %622 = vmatpush.bf16.msra.mxu1 %v553_v52 }
  0xdf   : > { %v546_v57 = vpop.permute.xlu1 %545  ;;  %v707_v58 = vpop.permute.xlu0 %706 }
  0xe0   : > { %v547_v59 = vsel %vm331_vm2, %v544_v51, %v546_v57  ;;  %v708_v60 = vsel %vm345_vm0, %v705_v47, %v707_v58  ;;  %v526_v10 = vpop.permute.xlu2 %525  ;;  %v1402_v47 = vld [vmem:[%s2006_s2 + $0x10] sm:$0x10] }
  0xe1   : > { %623 = vmatpush.bf16.msra.mxu1 %v547_v59  ;;  %806 = vmatpush.bf16.msra.mxu2 %v708_v60  ;;  %v1296_v48 = vor.u32 %v1402_v47, %v1295_v46 }
  0xe5   : > { %624 = vmatpush.bf16.msra.mxu1 %v1276_v63 }
  0xe7   : > { %v885_v2 = vpop.permute.xlu1 %884  ;;  %v699_v3 = vpop.permute.xlu0 %698 }
  0xe8   : > { %458 = vmatmul.bf16.gmra.mxu0 %v1252_v0  ;;  %v888_v4 = vsel %vm345_vm0, %v885_v2, %v887_v54  ;;  %v873_v14 = vpop.permute.xlu2 %872 }
  0xe9   : > { %986 = vmatpush.bf16.msra.mxu3 %v888_v4 }
  0xef   : > { %v701_v5 = vpop.permute.xlu1 %700  ;;  %v881_v6 = vpop.permute.xlu0 %880 }
  0xf0   : > { %v702_v7 = vsel %vm338_vm1, %v699_v3, %v701_v5  ;;  %v882_v9 = vsel %vm338_vm1, %v879_v1, %v881_v6  ;;  %v520_v27 = vpop.permute.xlu2 %519 }
  0xf1   : > { %807 = vmatpush.bf16.msra.mxu2 %v702_v7  ;;  %987 = vmatpush.bf16.msra.mxu3 %v882_v9 }
  0xf7   : > { %v524_v11 = vpop.permute.xlu1 %523  ;;  %v693_v12 = vpop.permute.xlu0 %692 }
  0xf8   : > { %v527_v13 = vsel %vm345_vm0, %v524_v11, %v526_v10  ;;  %v400_v53 = vpop.permute.xlu2 %399 }
  0xf9   : > { %625 = vmatpush.bf16.msra.mxu1 %v527_v13 }
  0xff   : > { %v695_v20 = vpop.permute.xlu1 %694  ;;  %v875_v21 = vpop.permute.xlu0 %874 }
 0x100   : > { %v696_v22 = vsel %vm331_vm2, %v693_v12, %v695_v20  ;;  %v876_v18 = vsel %vm331_vm2, %v873_v14, %v875_v21  ;;  %v415_v1 = vpop.permute.xlu2 %414 }
 0x101   : > { %808 = vmatpush.bf16.msra.mxu2 %v696_v22  ;;  %988 = vmatpush.bf16.msra.mxu3 %v876_v18 }
 0x105   : > { %809 = vmatpush.bf16.msra.mxu2 %v1308_v23  ;;  %989 = vmatpush.bf16.msra.mxu3 %v1348_v24 }
 0x107   : > { %v518_v28 = vpop.permute.xlu1 %517  ;;  %v512_v32 = vpop.permute.xlu0 %511 }
 0x108   : > { %810 = vmatmul.bf16.vlgmr.msra.gmra.mxu2 %v1409_v25  ;;  %990 = vmatmul.bf16.vlgmr.msra.gmra.mxu3 %v1418_v26  ;;  %v521_v29 = vsel %vm338_vm1, %v518_v28, %v520_v27  ;;  %v581_v10 = vpop.permute.xlu2 %580 }
 0x109   : > { %626 = vmatpush.bf16.msra.mxu1 %v521_v29 }
 0x10f   : > { %v514_v33 = vpop.permute.xlu1 %513  ;;  %v405_v58 = vpop.permute.xlu0 %404 }
 0x110   : > { %v515_v34 = vsel %vm331_vm2, %v512_v32, %v514_v33  ;;  %v1894_v19 = vpop.permute.xlu2 %595 }
 0x111   : > { %627 = vmatpush.bf16.msra.mxu1 %v515_v34 }
 0x115   : > { %628 = vmatpush.bf16.msra.mxu1 %v1264_v35 }
 0x117   : > { %v410_v61 = vpop.permute.xlu1 %409  ;;  %v420_v9 = vpop.permute.xlu0 %419 }
 0x118   : > { %629 = vmatmul.bf16.vlgmr.msra.gmra.mxu1 %v1400_v36  ;;  %815 = vmatmul.bf16.gmra.mxu2 %v1410_v37  ;;  %v762_v22 = vpop.permute.xlu2 %761 }
 0x119   : > { %995 = vmatmul.bf16.gmra.mxu3 %v1419_v38 }
 0x11f   : > { %v1892_v17 = vpop.permute.xlu0 %585 }
 0x120   : > { %v576_v4 = vpop.permute.xlu1 %575  ;;  %v1898_v24 = vpop.permute.xlu2 %776 }
 0x127   : > { %v1896_v21 = vpop.permute.xlu0 %600 }
 0x128   : > { %634 = vmatmul.bf16.gmra.mxu1 %v1401_v43  ;;  %820 = vmatmul.bf16.gmra.mxu2 %v1340_v44  ;;  %v1889_v12 = vpop.permute.xlu1 %590  ;;  %v942_v35 = vpop.permute.xlu2 %941 }
 0x129   : > { %1000 = vmatmul.bf16.gmra.mxu3 %v1380_v45 }
 0x12f   : > { %v767_v23 = vpop.permute.xlu0 %766 }
 0x130   : > { %v757_v20 = vpop.permute.xlu1 %756 }
 0x137   : > { %v1901_v34 = vpop.permute.xlu0 %781 }
 0x138   : > { %639 = vmatmul.bf16.gmra.mxu1 %v1296_v48  ;;  %v772_v18 = vpop.permute.xlu1 %771 }
 0x140   : > { %v937_v25 = vpop.permute.xlu1 %936 }
 0x145   : > { %v449_v49 = vpop.f32.mrf.mxu0 }
 0x146   : > { %v450_v50 = vadd.f32 %v449_v49, %v1753_v8  ;;  %v947_v49 = vpop.permute.xlu0 %946 }
 0x148   : > { %vm464_vm3 = vcmp.gt.f32.partialorder %v450_v50, 0.0  ;;  %v470_v51 = vmul.f32 -0.08, %v450_v50 }
 0x14a   : > { %v476_v52 = vsel %vm464_vm3, %v450_v50, %v470_v51 }
 0x14b   : > { %482 = vst [vmem:[%s1882_s28] sm:$0xff] %v476_v52 }
 0x14d   : > { %v451_v54 = vpop.f32.mrf.mxu0 }
 0x14e   : > { %v452_v55 = vadd.f32 %v451_v54, %v400_v53 }
 0x150   : > { %vm465_vm4 = vcmp.gt.f32.partialorder %v452_v55, 0.0  ;;  %v471_v56 = vmul.f32 -0.08, %v452_v55 }
 0x152   : > { %v477_v57 = vsel %vm465_vm4, %v452_v55, %v471_v56 }
 0x153   : > { %483 = vst [vmem:[%s1882_s28 + $0x20] sm:$0xff] %v477_v57 }
 0x155   : > { %v454_v59 = vpop.f32.mrf.mxu0 }
 0x156   : > { %v455_v8 = vadd.f32 %v454_v59, %v405_v58 }
 0x158   : > { %vm466_vm5 = vcmp.gt.f32.partialorder %v455_v8, 0.0  ;;  %v472_v60 = vmul.f32 -0.08, %v455_v8 }
 0x15a   : > { %v478_v62 = vsel %vm466_vm5, %v455_v8, %v472_v60 }
 0x15b   : > { %484 = vst [vmem:[%s1882_s28 + $0x40] sm:$0xff] %v478_v62 }
 0x15d   : > { %v456_v63 = vpop.f32.mrf.mxu0 }
 0x15e   : > { %v457_v0 = vadd.f32 %v456_v63, %v410_v61  ;;  %v952_v61 = vpop.permute.xlu1 %951 }
 0x160   : > { %vm467_vm6 = vcmp.gt.f32.partialorder %v457_v0, 0.0  ;;  %v473_v2 = vmul.f32 -0.08, %v457_v0 }
 0x162   : > { %v479_v3 = vsel %vm467_vm6, %v457_v0, %v473_v2 }
 0x163   : > { %485 = vst [vmem:[%s1882_s28 + $0x60] sm:$0xff] %v479_v3 }
 0x165   : > { %v459_v5 = vpop.f32.mrf.mxu0 }
 0x166   : > { %v460_v6 = vadd.f32 %v459_v5, %v415_v1 }
 0x168   : > { %vm468_vm7 = vcmp.gt.f32.partialorder %v460_v6, 0.0  ;;  %v474_v7 = vmul.f32 -0.08, %v460_v6 }
 0x16a   : > { %v480_v11 = vsel %vm468_vm7, %v460_v6, %v474_v7 }
 0x16b   : > { %486 = vst [vmem:[%s1882_s28 + $0x80] sm:$0xff] %v480_v11  ;;  %v957_v11 = vpop.permute.xlu2 %956 }
 0x16d   : > { %v461_v13 = vpop.f32.mrf.mxu0 }
 0x16e   : > { %v462_v14 = vadd.f32 %v461_v13, %v420_v9 }
 0x170   : > { %vm469_vm8 = vcmp.gt.f32.partialorder %v462_v14, 0.0  ;;  %v475_v15 = vmul.f32 -0.08, %v462_v14 }
 0x172   : > { %v481_v16 = vsel %vm469_vm8, %v462_v14, %v475_v15 }
 0x173   : > { %487 = vst [vmem:[%s1882_s28 + $0xa0] sm:$0x1] %v481_v16 }
 0x18b   : > { %v811_v26 = vpop.f32.mrf.mxu2  ;;  %v991_v27 = vpop.f32.mrf.mxu3 }
 0x18c   : > { %v812_v28 = vadd.f32 %v811_v26, %v757_v20  ;;  %v992_v29 = vadd.f32 %v991_v27, %v937_v25  ;;  %v962_v27 = vpop.permute.xlu0 %961 }
 0x18e   : > { %vm826_vm9 = vcmp.gt.f32.partialorder %v812_v28, 0.0  ;;  %v832_v30 = vmul.f32 -0.08, %v812_v28  ;;  %vm1006_vm10 = vcmp.gt.f32.partialorder %v992_v29, 0.0  ;;  %v1012_v31 = vmul.f32 -0.08, %v992_v29 }
 0x190   : > { %v838_v32 = vsel %vm826_vm9, %v812_v28, %v832_v30  ;;  %v1018_v33 = vsel %vm1006_vm10, %v992_v29, %v1012_v31 }
 0x191   : > { %844 = vst [vmem:[%s1882_s28 + $0x10] sm:$0xff] %v838_v32 }
 0x192   : > { %1024 = vst [vmem:[%s1882_s28 + $0x18] sm:$0xff] %v1018_v33 }
 0x193   : > { %v813_v36 = vpop.f32.mrf.mxu2  ;;  %v993_v37 = vpop.f32.mrf.mxu3 }
 0x194   : > { %v814_v38 = vadd.f32 %v813_v36, %v762_v22  ;;  %v994_v39 = vadd.f32 %v993_v37, %v942_v35 }
 0x195   : > { %v630_v40 = vpop.f32.mrf.mxu1 }
 0x196   : > { %vm827_vm11 = vcmp.gt.f32.partialorder %v814_v38, 0.0  ;;  %v833_v41 = vmul.f32 -0.08, %v814_v38  ;;  %vm1007_vm12 = vcmp.gt.f32.partialorder %v994_v39, 0.0  ;;  %v1013_v42 = vmul.f32 -0.08, %v994_v39 }
 0x197   : > { %v631_v43 = vadd.f32 %v630_v40, %v576_v4 }
 0x198   : > { %v839_v44 = vsel %vm827_vm11, %v814_v38, %v833_v41  ;;  %v1019_v45 = vsel %vm1007_vm12, %v994_v39, %v1013_v42  ;;  %v1058_v42 = vld [vmem:[%s1882_s28 + $0x10] sm:$0xff] (%p1616_p5) }
 0x199   : > { %845 = vst [vmem:[%s1882_s28 + $0x30] sm:$0xff] %v839_v44  ;;  %vm645_vm13 = vcmp.gt.f32.partialorder %v631_v43, 0.0  ;;  %v651_v46 = vmul.f32 -0.08, %v631_v43  ;;  %v1062_v44 = vld [vmem:[%s1882_s28 + $0x20] sm:$0xff] (%p1616_p5) }
 0x19a   : > { %1025 = vst [vmem:[%s1882_s28 + $0x38] sm:$0xff] %v1019_v45 }
 0x19b   : > { %v657_v47 = vsel %vm645_vm13, %v631_v43, %v651_v46  ;;  %v816_v48 = vpop.f32.mrf.mxu2  ;;  %v1060_v43 = vld [vmem:[%s1882_s28 + $0x18] sm:$0xff] (%p1616_p5)  ;;  %1059 = vst [vmem:[%s1935_s26 + $0x10] sm:$0xff] (%p1616_p5), %v1058_v42 }
 0x19c   : > { %663 = vst [vmem:[%s1882_s28 + $0x8] sm:$0xff] %v657_v47  ;;  %v817_v50 = vadd.f32 %v816_v48, %v767_v23  ;;  %v996_v51 = vpop.f32.mrf.mxu3  ;;  %v1070_v48 = vld [vmem:[%s1882_s28 + $0x40] sm:$0xff] (%p1616_p5) }
 0x19d   : > { %v997_v52 = vadd.f32 %v996_v51, %v947_v49  ;;  %v632_v53 = vpop.f32.mrf.mxu1  ;;  %1061 = vst [vmem:[%s1935_s26 + $0x18] sm:$0xff] (%p1616_p5), %v1060_v43 }
 0x19e   : > { %vm828_vm14 = vcmp.gt.f32.partialorder %v817_v50, 0.0  ;;  %v834_v54 = vmul.f32 -0.08, %v817_v50  ;;  %v633_v55 = vadd.f32 %v632_v53, %v581_v10  ;;  %1063 = vst [vmem:[%s1935_s26 + $0x40] sm:$0xff] (%p1616_p5), %v1062_v44 }
 0x19f   : > { %vm1008_vm15 = vcmp.gt.f32.partialorder %v997_v52, 0.0  ;;  %v1014_v56 = vmul.f32 -0.08, %v997_v52  ;;  %1071 = vst [vmem:[%s1935_s26 + $0x80] sm:$0xff] (%p1616_p5), %v1070_v48 }
 0x1a0   : > { %v840_v57 = vsel %vm828_vm14, %v817_v50, %v834_v54  ;;  %vm646_vm0 = vcmp.gt.f32.partialorder %v633_v55, 0.0  ;;  %v652_v58 = vmul.f32 -0.08, %v633_v55  ;;  %v1066_v46 = vld [vmem:[%s1882_s28 + $0x30] sm:$0xff] (%p1616_p5) }
 0x1a1   : > { %846 = vst [vmem:[%s1882_s28 + $0x50] sm:$0xff] %v840_v57  ;;  %v1020_v59 = vsel %vm1008_vm15, %v997_v52, %v1014_v56  ;;  %v1068_v47 = vld [vmem:[%s1882_s28 + $0x38] sm:$0xff] (%p1616_p5)  ;;  %v1078_v52 = vld [vmem:[%s1882_s28 + $0x60] sm:$0xff] (%p1616_p5) }
 0x1a2   : > { %1026 = vst [vmem:[%s1882_s28 + $0x58] sm:$0xff] %v1020_v59  ;;  %v658_v8 = vsel %vm646_vm0, %v633_v55, %v652_v58  ;;  %v1086_v56 = vld [vmem:[%s1882_s28 + $0x80] sm:$0xff] (%p1616_p5) }
 0x1a3   : > { %664 = vst [vmem:[%s1882_s28 + $0x28] sm:$0xff] %v658_v8  ;;  %v818_v60 = vpop.f32.mrf.mxu2  ;;  %v1094_v8 = vld [vmem:[%s1882_s28 + $0xa0] sm:$0xff] (%p1616_p5) }
 0x1a4   : > { %v819_v62 = vadd.f32 %v818_v60, %v772_v18  ;;  %v998_v63 = vpop.f32.mrf.mxu3  ;;  %1067 = vst [vmem:[%s1935_s26 + $0x50] sm:$0xff] (%p1616_p5), %v1066_v46 }
 0x1a5   : > { %v999_v0 = vadd.f32 %v998_v63, %v952_v61  ;;  %v635_v1 = vpop.f32.mrf.mxu1  ;;  %1069 = vst [vmem:[%s1935_s26 + $0x58] sm:$0xff] (%p1616_p5), %v1068_v47 }
 0x1a6   : > { %vm829_vm1 = vcmp.gt.f32.partialorder %v819_v62, 0.0  ;;  %v835_v2 = vmul.f32 -0.08, %v819_v62  ;;  %v636_v3 = vadd.f32 %v635_v1, %v1892_v17  ;;  %1079 = vst [vmem:[%s1935_s26 + $0xc0] sm:$0xff] (%p1616_p5), %v1078_v52 }
 0x1a7   : > { %vm1009_vm2 = vcmp.gt.f32.partialorder %v999_v0, 0.0  ;;  %v1015_v4 = vmul.f32 -0.08, %v999_v0  ;;  %1087 = vst [vmem:[%s1935_s26 + $0x100] sm:$0xff] (%p1616_p5), %v1086_v56 }
 0x1a8   : > { %v841_v5 = vsel %vm829_vm1, %v819_v62, %v835_v2  ;;  %vm647_vm3 = vcmp.gt.f32.partialorder %v636_v3, 0.0  ;;  %v653_v6 = vmul.f32 -0.08, %v636_v3  ;;  %v1074_v50 = vld [vmem:[%s1882_s28 + $0x50] sm:$0xff] (%p1616_p5)  ;;  %1095 = vst [vmem:[%s1935_s26 + $0x140] sm:$0xff] (%p1616_p5), %v1094_v8 }
 0x1a9   : > { %847 = vst [vmem:[%s1882_s28 + $0x70] sm:$0xff] %v841_v5  ;;  %v1021_v7 = vsel %vm1009_vm2, %v999_v0, %v1015_v4  ;;  %v1076_v51 = vld [vmem:[%s1882_s28 + $0x58] sm:$0xff] (%p1616_p5) }
 0x1aa   : > { %1027 = vst [vmem:[%s1882_s28 + $0x78] sm:$0xff] %v1021_v7  ;;  %v659_v9 = vsel %vm647_vm3, %v636_v3, %v653_v6  ;;  %v1064_v45 = vld [vmem:[%s1882_s28 + $0x28] sm:$0xff] (%p1616_p5) }
 0x1ab   : > { %665 = vst [vmem:[%s1882_s28 + $0x48] sm:$0xff] %v659_v9  ;;  %v821_v10 = vpop.f32.mrf.mxu2 }
 0x1ac   : > { %v822_v13 = vadd.f32 %v821_v10, %v1898_v24  ;;  %v1001_v14 = vpop.f32.mrf.mxu3  ;;  %1065 = vst [vmem:[%s1935_s26 + $0x48] sm:$0xff] (%p1616_p5), %v1064_v45 }
 0x1ad   : > { %v1002_v15 = vadd.f32 %v1001_v14, %v957_v11  ;;  %v637_v16 = vpop.f32.mrf.mxu1  ;;  %1075 = vst [vmem:[%s1935_s26 + $0x90] sm:$0xff] (%p1616_p5), %v1074_v50 }
 0x1ae   : > { %vm830_vm4 = vcmp.gt.f32.partialorder %v822_v13, 0.0  ;;  %v836_v17 = vmul.f32 -0.08, %v822_v13  ;;  %v638_v20 = vadd.f32 %v637_v16, %v1889_v12  ;;  %1077 = vst [vmem:[%s1935_s26 + $0x98] sm:$0xff] (%p1616_p5), %v1076_v51 }
 0x1af   : > { %vm1010_vm5 = vcmp.gt.f32.partialorder %v1002_v15, 0.0  ;;  %v1016_v22 = vmul.f32 -0.08, %v1002_v15 }
 0x1b0   : > { %v842_v18 = vsel %vm830_vm4, %v822_v13, %v836_v17  ;;  %vm648_vm6 = vcmp.gt.f32.partialorder %v638_v20, 0.0  ;;  %v654_v23 = vmul.f32 -0.08, %v638_v20  ;;  %v1082_v54 = vld [vmem:[%s1882_s28 + $0x70] sm:$0xff] (%p1616_p5) }
 0x1b1   : > { %848 = vst [vmem:[%s1882_s28 + $0x90] sm:$0xff] %v842_v18  ;;  %v1022_v25 = vsel %vm1010_vm5, %v1002_v15, %v1016_v22  ;;  %v1084_v55 = vld [vmem:[%s1882_s28 + $0x78] sm:$0xff] (%p1616_p5) }
 0x1b2   : > { %1028 = vst [vmem:[%s1882_s28 + $0x98] sm:$0xff] %v1022_v25  ;;  %v660_v26 = vsel %vm648_vm6, %v638_v20, %v654_v23  ;;  %v1072_v49 = vld [vmem:[%s1882_s28 + $0x48] sm:$0xff] (%p1616_p5) }
 0x1b3   : > { %666 = vst [vmem:[%s1882_s28 + $0x68] sm:$0xff] %v660_v26  ;;  %v823_v24 = vpop.f32.mrf.mxu2 }
 0x1b4   : > { %v824_v28 = vadd.f32 %v823_v24, %v1901_v34  ;;  %v1003_v29 = vpop.f32.mrf.mxu3  ;;  %1073 = vst [vmem:[%s1935_s26 + $0x88] sm:$0xff] (%p1616_p5), %v1072_v49 }
 0x1b5   : > { %v1004_v30 = vadd.f32 %v1003_v29, %v962_v27  ;;  %v640_v12 = vpop.f32.mrf.mxu1  ;;  %1083 = vst [vmem:[%s1935_s26 + $0xd0] sm:$0xff] (%p1616_p5), %v1082_v54 }
 0x1b6   : > { %vm831_vm7 = vcmp.gt.f32.partialorder %v824_v28, 0.0  ;;  %v837_v31 = vmul.f32 -0.08, %v824_v28  ;;  %v641_v32 = vadd.f32 %v640_v12, %v1894_v19  ;;  %v1054_v19 = vld [vmem:[%s1882_s28] sm:$0xff] (%p1616_p5)  ;;  %1085 = vst [vmem:[%s1935_s26 + $0xd8] sm:$0xff] (%p1616_p5), %v1084_v55 }
 0x1b7   : > { %vm1011_vm8 = vcmp.gt.f32.partialorder %v1004_v30, 0.0  ;;  %v1017_v33 = vmul.f32 -0.08, %v1004_v30  ;;  %1055 = vst [vmem:[%s1935_s26] sm:$0xff] (%p1616_p5), %v1054_v19 }
 0x1b8   : > { %v843_v35 = vsel %vm831_vm7, %v824_v28, %v837_v31  ;;  %vm649_vm9 = vcmp.gt.f32.partialorder %v641_v32, 0.0  ;;  %v655_v36 = vmul.f32 -0.08, %v641_v32  ;;  %v1090_v58 = vld [vmem:[%s1882_s28 + $0x90] sm:$0xff] (%p1616_p5) }
 0x1b9   : > { %849 = vst [vmem:[%s1882_s28 + $0xb0] sm:$0x1] %v843_v35  ;;  %v1023_v37 = vsel %vm1011_vm8, %v1004_v30, %v1017_v33  ;;  %v1092_v59 = vld [vmem:[%s1882_s28 + $0x98] sm:$0xff] (%p1616_p5) }
 0x1ba   : > { %1029 = vst [vmem:[%s1882_s28 + $0xb8] sm:$0x1] %v1023_v37  ;;  %v661_v38 = vsel %vm649_vm9, %v641_v32, %v655_v36  ;;  %v1080_v53 = vld [vmem:[%s1882_s28 + $0x68] sm:$0xff] (%p1616_p5) }
 0x1bb   : > { %667 = vst [vmem:[%s1882_s28 + $0x88] sm:$0xff] %v661_v38 }
 0x1bc   : > { %1081 = vst [vmem:[%s1935_s26 + $0xc8] sm:$0xff] (%p1616_p5), %v1080_v53 }
 0x1bd   : > { %v642_v34 = vpop.f32.mrf.mxu1  ;;  %1091 = vst [vmem:[%s1935_s26 + $0x110] sm:$0xff] (%p1616_p5), %v1090_v58 }
 0x1be   : > { %v643_v39 = vadd.f32 %v642_v34, %v1896_v21  ;;  %v1056_v21 = vld [vmem:[%s1882_s28 + $0x8] sm:$0xff] (%p1616_p5)  ;;  %1093 = vst [vmem:[%s1935_s26 + $0x118] sm:$0xff] (%p1616_p5), %v1092_v59 }
 0x1bf   : > { %1036 = sbr.rel (!%p1616_p5) target bundleno = 460 (0x1cc), region = 40  ;;  %1057 = vst [vmem:[%s1935_s26 + $0x8] sm:$0xff] (%p1616_p5), %v1056_v21 }
 0x1c0   : > { %vm650_vm10 = vcmp.gt.f32.partialorder %v643_v39, 0.0  ;;  %v656_v40 = vmul.f32 -0.08, %v643_v39  ;;  %v1098_v61 = vld [vmem:[%s1882_s28 + $0xb0] sm:$0xff] (%p1616_p5) }
 0x1c1   : > { %v1100_v62 = vld [vmem:[%s1882_s28 + $0xb8] sm:$0xff] (%p1616_p5)  ;;  %1099 = vst [vmem:[%s1935_s26 + $0x150] sm:$0xff] (%p1616_p5), %v1098_v61 }
 0x1c2   : > { %v662_v41 = vsel %vm650_vm10, %v643_v39, %v656_v40  ;;  %v1088_v57 = vld [vmem:[%s1882_s28 + $0x88] sm:$0xff] (%p1616_p5)  ;;  %1101 = vst [vmem:[%s1935_s26 + $0x158] sm:$0xff] (%p1616_p5), %v1100_v62 }
 0x1c3   : > { %668 = vst [vmem:[%s1882_s28 + $0xa8] sm:$0x1] %v662_v41 }
 0x1c4   : > { %1089 = vst [vmem:[%s1935_s26 + $0x108] sm:$0xff] %v1088_v57 }
 0x1ca   : > { %v1096_v60 = vld [vmem:[%s1882_s28 + $0xa8] sm:$0xff] }
 0x1cb   : > { %1097 = vst [vmem:[%s1935_s26 + $0x148] sm:$0xff] %v1096_v60 }
 0x1cc PF: > { %s14_s21 = sadd.s32 1, %s1541_s21   ;;  %s2010_s15 = smov %s1521_s16 }
 0x1cd   : > { %p11_p12 = scmp.ge.s32.totalorder %s14_s21, 6   ;;  %s2011_s16 = smov %s1627_s30 }
 0x1ce   : > { %s2012_s17 = smov %s1533_s19  ;;  %s2013_s18 = smov %s1537_s20 }
 0x1cf   : > { %s2014_s19 = smov %s2017_s22  ;;  %s2015_s20 = smov %s2021_s23 }
 0x1d0   :  { %13 = sbr.rel (!%p11_p12) target bundleno = 4 (0x4), region = 95 }

</bundles_post_ra>
